<compile_context>
chip_gen: v7x
topology: tpu7x:2x2x1
jax: 0.10.0
libtpu: 0.0.40
codegen_flags: <defaults>
</compile_context>

<pallas_src>
import functools

import jax
import jax.numpy as jnp
from jax import lax
from jax.experimental import pallas as pl
from jax.experimental.pallas import tpu as pltpu


def _patch_dropout_kernel(idx_ref, x_ref, o_ref, *, precision):
    """Gather kept token rows for a (block_b, N, block_d) tile via a one-hot MXU matmul.

    idx_ref : VMEM (block_b, n_out, 1) int32  -- token indices to keep (cls folded in)
    x_ref   : VMEM (block_b, N, block_d)      -- all tokens for these batch elements
    o_ref   : VMEM (block_b, n_out, block_d)  -- gathered (kept) tokens
    """
    bt, n_out, _ = idx_ref.shape
    n_tokens = x_ref.shape[1]

    # onehot[b, k, n] = 1 iff idx[b, k] == n   (lane iota + compare on the VPU; the
    # (bt, n_out, 1) -> (bt, n_out, n_tokens) broadcast is a cheap lane broadcast).
    token_iota = lax.broadcasted_iota(jnp.int32, (bt, n_out, n_tokens), 2)
    onehot = (idx_ref[...] == token_iota).astype(x_ref.dtype)

    # Gather-as-matmul: exactly one nonzero (1.0) per output row -> exact pass-through.
    gathered = jnp.einsum(
        "bkn,bnd->bkd",
        onehot,
        x_ref[...],
        preferred_element_type=jnp.float32,
        precision=precision,
    )
    o_ref[...] = gathered.astype(o_ref.dtype)


def _pick_block_d(D):
    if D % 128 != 0:
        # TODO(synk): D not a multiple of 128 produces masked (vst.msk) partial stores;
        # pad/pack the hidden dim to a multiple of 128 upstream for full store bandwidth.
        return D
    for bd in (512, 256, 128):
        if D % bd == 0:
            return bd
    return D


def _pick_block_b(B, N, block_d, itemsize, budget_bytes=8 << 20):
    # Largest small divisor of B whose x-block still fits a conservative VMEM budget
    # (double-buffered by the pipeline), so it stays portable to v7x's 64 MiB VMEM.
    for bb in (8, 4, 2, 1):
        if B % bb == 0 and bb * N * block_d * itemsize <= budget_bytes:
            return bb
    return 1


def patch_dropout(x, prob, key, *, exclude_first_token=True, training=True):
    """JAX/Pallas equivalent of PatchDropout.forward.

    Returns (output, patch_indices_keep); in eval mode or prob == 0 returns (x, None).
    """
    if (not training) or prob == 0.0:
        return x, None

    B, N, D = x.shape
    num_tokens = N - 1 if exclude_first_token else N
    keep_prob = 1.0 - prob
    num_keep = max(1, int(num_tokens * keep_prob))

    # torch.randn(batch, num_tokens).topk(num_keep).indices
    # (indices ordered by descending value -- same semantics as lax.top_k).
    rand = jax.random.normal(key, (B, num_tokens), dtype=jnp.float32)
    _, patch_indices_keep = lax.top_k(rand, num_keep)
    patch_indices_keep = patch_indices_keep.astype(jnp.int32)

    # Fold the cls-token passthrough into the gather: shift kept indices past the cls
    # token and prepend index 0, so the kernel emits the full output in one dense gather.
    if exclude_first_token:
        gather_idx = jnp.concatenate(
            [jnp.zeros((B, 1), jnp.int32), patch_indices_keep + 1], axis=1
        )
    else:
        gather_idx = patch_indices_keep
    n_out = gather_idx.shape[1]
    gather_idx = gather_idx[..., None]  # (B, n_out, 1): indices on sublanes, lane dim 1

    block_d = _pick_block_d(D)
    block_b = _pick_block_b(B, N, block_d, x.dtype.itemsize)
    grid = (B // block_b, D // block_d)

    kernel = functools.partial(_patch_dropout_kernel, precision=lax.Precision.HIGHEST)

    out = pl.pallas_call(
        kernel,
        out_shape=jax.ShapeDtypeStruct((B, n_out, D), x.dtype),
        grid=grid,
        in_specs=[
            pl.BlockSpec((block_b, n_out, 1), lambda b, d: (b, 0, 0)),
            pl.BlockSpec((block_b, N, block_d), lambda b, d: (b, 0, d)),
        ],
        out_specs=pl.BlockSpec((block_b, n_out, block_d), lambda b, d: (b, 0, d)),
        compiler_params=pltpu.CompilerParams(
            # Both grid axes are independent -> shard across TensorCores (v7x megacore).
            dimension_semantics=("parallel", "parallel"),
        ),
    )(gather_idx, x)
    # TODO(synk): at very high drop rates, skip DMA-ing dropped tokens entirely by keeping
    # x in memory_space=pl.ANY and manually DMA-gathering only the kept rows (P4 pattern).
    return out, patch_indices_keep


def _reference(x, patch_indices_keep, exclude_first_token=True):
    """Pure-JAX reference mirroring the PyTorch gather semantics."""
    if exclude_first_token:
        cls_tokens, xs = x[:, :1], x[:, 1:]
        gathered = jnp.take_along_axis(xs, patch_indices_keep[..., None], axis=1)
        return jnp.concatenate([cls_tokens, gathered], axis=1)
    return jnp.take_along_axis(x, patch_indices_keep[..., None], axis=1)


if __name__ == "__main__":
    key = jax.random.PRNGKey(0)
    k_x, k_drop = jax.random.split(key)

    # B=2, N=65 (1 cls token + 64 patches), D=128 (lane-dense hidden dim).
    B, N, D = 2, 65, 128
    x = jax.random.uniform(k_x, (B, N, D), dtype=jnp.float32)

    prob = 0.5  # keep 32 of 64 patches -> output (2, 33, 128)
    out, idx = patch_dropout(x, prob, k_drop, exclude_first_token=True, training=True)
    out = jax.block_until_ready(out)

    ref = _reference(x, idx, exclude_first_token=True)
    assert out.shape == (B, 1 + 32, D), out.shape
    assert jnp.allclose(out, ref, rtol=1e-6, atol=1e-6), "mismatch vs reference gather"

    # Also exercise the exclude_first_token=False path.
    out2, idx2 = patch_dropout(x, prob, k_drop, exclude_first_token=False, training=True)
    out2 = jax.block_until_ready(out2)
    ref2 = _reference(x, idx2, exclude_first_token=False)
    assert out2.shape == (B, 32, D), out2.shape
    assert jnp.allclose(out2, ref2, rtol=1e-6, atol=1e-6), "mismatch (no cls) vs reference"

    print("KERNEL_OK")
</pallas_src>

<mosaic_0001>
module attributes {stable_mosaic.version = 11 : i64} {
  func.func @_patch_dropout_kernel(%arg0: i32, %arg1: i32, %arg2: memref<2x33x1xi32, #tpu.memory_space<vmem>>, %arg3: memref<2x65x128xf32, #tpu.memory_space<vmem>>, %arg4: memref<2x33x128xf32, #tpu.memory_space<vmem>>) attributes {dimension_semantics = [#tpu.dimension_semantics<parallel>, #tpu.dimension_semantics<parallel>], iteration_bounds = array<i64: 1, 1>, scalar_prefetch = 0 : i64, scratch_operands = 0 : i64, tpu.core_type = #tpu.core_type<tc>, window_params = [{transform_indices = @transform_0, window_bounds = array<i64: 2, 33, 1>}, {transform_indices = @transform_1, window_bounds = array<i64: 2, 65, 128>}, {transform_indices = @transform_2, window_bounds = array<i64: 2, 33, 128>}]} {
    %0 = tpu.iota {dimensions = array<i32: 2>} : vector<2x33x65xi32>
    %c0 = arith.constant 0 : index
    %c0_0 = arith.constant 0 : index
    %c0_1 = arith.constant 0 : index
    %1 = vector.load %arg2[%c0, %c0_0, %c0_1] : memref<2x33x1xi32, #tpu.memory_space<vmem>>, vector<2x33x1xi32>
    %2 = vector.broadcast %1 : vector<2x33x1xi32> to vector<2x33x65xi32>
    %3 = arith.cmpi eq, %2, %0 : vector<2x33x65xi32>
    %4 = arith.extui %3 : vector<2x33x65xi1> to vector<2x33x65xi32>
    %5 = arith.sitofp %4 : vector<2x33x65xi32> to vector<2x33x65xf32>
    %c0_2 = arith.constant 0 : index
    %c0_3 = arith.constant 0 : index
    %c0_4 = arith.constant 0 : index
    %6 = vector.load %arg3[%c0_2, %c0_3, %c0_4] : memref<2x65x128xf32, #tpu.memory_space<vmem>>, vector<2x65x128xf32>
    "tpu.trace_start"() <{level = 10 : i32, message = "bkn,bnd->bkd"}> : () -> ()
    %cst = arith.constant dense<0.000000e+00> : vector<2x33x128xf32>
    %7 = tpu.matmul %5, %6, %cst {dimension_numbers = #tpu.dot_dimension_numbers<[2], [1], [1], [2], [0, 0, 0, 1, 1, 2], [0], [0]>, precision = #tpu.contract_precision<fp32>} : vector<2x33x65xf32>, vector<2x65x128xf32>, vector<2x33x128xf32> -> vector<2x33x128xf32>
    "tpu.trace_stop"() : () -> ()
    %c0_5 = arith.constant 0 : index
    %c0_6 = arith.constant 0 : index
    %c0_7 = arith.constant 0 : index
    %8 = vector.load %arg4[%c0_5, %c0_6, %c0_7] : memref<2x33x128xf32, #tpu.memory_space<vmem>>, vector<2x33x128xf32>
    tpu.vector_store %arg4[%c0_5, %c0_6, %c0_7], %7 {strides = array<i32>} : memref<2x33x128xf32, #tpu.memory_space<vmem>>, vector<2x33x128xf32>,
    return
  }
  func.func @transform_0(%arg0: i32, %arg1: i32) -> (i32, i32, i32) {
    %c0_i32 = arith.constant 0 : i32
    %c0_i32_0 = arith.constant 0 : i32
    %c0_i32_1 = arith.constant 0 : i32
    return %arg0, %c0_i32, %c0_i32_0 : i32, i32, i32
  }
  func.func @transform_1(%arg0: i32, %arg1: i32) -> (i32, i32, i32) {
    %c0_i32 = arith.constant 0 : i32
    %c0_i32_0 = arith.constant 0 : i32
    return %arg0, %c0_i32, %arg1 : i32, i32, i32
  }
  func.func @transform_2(%arg0: i32, %arg1: i32) -> (i32, i32, i32) {
    %c0_i32 = arith.constant 0 : i32
    %c0_i32_0 = arith.constant 0 : i32
    return %arg0, %c0_i32, %arg1 : i32, i32, i32
  }
}

</mosaic_0001>

<bundles_post_ra>
// kernel: tpu_custom_call.1
= control target key start
LH: loop header
LB: loop body
LE: loop exit
PB: predicated region body
PF: predicated region fallthrough
CT: control target
= control target key end

     0   :  { %v2451_v0 = vmov 0   ;;  %v3241_v5 = vmov 0.0|0.0   ;;  %vm117_vm0 = vcmask 1040384   ;;  %vm2453_vm1 = vmmov 0   ;;  %s3234_s0 = inlined_call_operand.vmem [shape: s32[2,33,1], index: 0, kind: input, shape index: {}]   ;;  %s3235_s1 = inlined_call_operand.vmem [shape: f32[2,65,128], index: 1, kind: input, shape index: {}]   ;;  %s3236_s2 = inlined_call_operand.vmem [shape: f32[2,33,128], index: 2, kind: output, shape index: {}]  }
   0x1   :  { %2450 = vset.pattern.permute.xlu1 %v2451_v0  ;;  %2449 = vset.pattern.permute.xlu0 %v2451_v0  ;;  %v14_v1 = vld [vmem:[%s3234_s0 + $0x8] sm:$0xff]  ;;  %v13_v2 = vld [vmem:[%s3234_s0] sm:$0xff]  ;;  %v19_v3 = vld [vmem:[%s3234_s0 + $0x30] sm:$0xff]  ;;  %vm101_vm2 = vcmask 531456  }
   0x2   :  { %27 = vperm.xlu1 %2450, %v14_v1   ;;  %24 = vperm.xlu0 %2449, %v13_v2   ;;  %v18_v4 = vld [vmem:[%s3234_s0 + $0x28] sm:$0xff]  ;;  %v83_v6 = vld [vmem:[%s3235_s1] sm:$0xff]  ;;  %v20_v8 = vld [vmem:[%s3234_s0 + $0x38] sm:$0xff] }
   0x3   :  { %2201 = vmatprep.subr.bf16.mxu0 %v3241_v5  ;;  %2273 = vmatprep.subr.bf16.mxu1 %v3241_v5  ;;  %v84_v7 = vld [vmem:[%s3235_s1 + $0x8] sm:$0xff]  ;;  %v15_v9 = vld [vmem:[%s3234_s0 + $0x10] sm:$0xff]  ;;  %v122_v10 = vand.u32 4294901760, %v83_v6  ;;  %v86_v17 = vld [vmem:[%s3235_s1 + $0x18] sm:$0xff] }
   0x4   :  { %v125_v11 = vand.u32 4294901760, %v84_v7  ;;  %v92_v12 = vld [vmem:[%s3235_s1 + $0x48] sm:$0xff]  ;;  %v93_v13 = vld [vmem:[%s3235_s1 + $0x50] sm:$0xff]  ;;  %v94_v19 = vld [vmem:[%s3235_s1 + $0x58] sm:$0xff]  ;;  %v131_v24 = vand.u32 4294901760, %v86_v17 }
   0x5   :  { %v85_v14 = vld [vmem:[%s3235_s1 + $0x10] sm:$0xff]  ;;  %v862_v15 = vand.u32 4294901760, %v92_v12  ;;  %v865_v16 = vand.u32 4294901760, %v93_v13  ;;  %v95_v20 = vld [vmem:[%s3235_s1 + $0x60] sm:$0xff]  ;;  %v2516_v22 = vsub.f32 %v83_v6, %v122_v10  ;;  %v88_v26 = vld [vmem:[%s3235_s1 + $0x28] sm:$0xff]  ;;  %v868_v36 = vand.u32 4294901760, %v94_v19 }
   0x6   :  { %42 = vperm.xlu1 %2450, %v19_v3   ;;  %39 = vperm.xlu0 %2449, %v18_v4   ;;  %v128_v18 = vand.u32 4294901760, %v85_v14  ;;  %v2514_v21 = vpack.c.bf16 %v125_v11, %v122_v10  ;;  %v2518_v23 = vsub.f32 %v84_v7, %v125_v11  ;;  %v87_v25 = vld [vmem:[%s3235_s1 + $0x20] sm:$0xff]  ;;  %v96_v27 = vld [vmem:[%s3235_s1 + $0x68] sm:$0xff]  ;;  %v97_v32 = vld [vmem:[%s3235_s1 + $0x70] sm:$0xff]  ;;  %v2546_v35 = vsub.f32 %v86_v17, %v131_v24 }
   0x7   :  { %v2529_v28 = vpack.c.bf16 %v865_v16, %v862_v15  ;;  %v2531_v29 = vsub.f32 %v92_v12, %v862_v15  ;;  %v2533_v30 = vsub.f32 %v93_v13, %v865_v16  ;;  %v89_v33 = vld [vmem:[%s3235_s1 + $0x30] sm:$0xff]  ;;  %v871_v37 = vand.u32 4294901760, %v95_v20  ;;  %v21_v38 = vld [vmem:[%s3234_s0 + $0x40] sm:$0xff]  ;;  %v90_v43 = vld [vmem:[%s3235_s1 + $0x38] sm:$0xff] }
   0x8   :  { %v2535_v31 = vsub.f32 %v85_v14, %v128_v18  ;;  %2203 = vmatpush3.bf16.msra.mxu0 %v2514_v21  ;;  %v2544_v34 = vpack.c.bf16 %v131_v24, %v128_v18  ;;  %v134_v39 = vand.u32 4294901760, %v87_v25  ;;  %v137_v40 = vand.u32 4294901760, %v88_v26  ;;  %v16_v44 = vld [vmem:[%s3234_s0 + $0x18] sm:$0xff]  ;;  %v99_v50 = vld [vmem:[%s3235_s1 + $0x80] sm:$0xff]  ;;  %v100_v59 = vld [vmem:[%s3235_s1 + $0x88] sm:$0x1] }
   0x9   :  { %v874_v41 = vand.u32 4294901760, %v96_v27  ;;  %v877_v42 = vand.u32 4294901760, %v97_v32  ;;  %2204 = vmatprep.subr.bf16.mxu0 %v3241_v5  ;;  %2275 = vmatpush3.bf16.msra.mxu1 %v2529_v28  ;;  %v2559_v45 = vpack.c.bf16 %v871_v37, %v868_v36  ;;  %v2561_v46 = vsub.f32 %v94_v19, %v868_v36  ;;  %v98_v49 = vld [vmem:[%s3235_s1 + $0x78] sm:$0xff]  ;;  %v91_v54 = vld [vmem:[%s3235_s1 + $0x40] sm:$0x1] }
   0xa   :  { %45 = vperm.xlu1 %2450, %v20_v8   ;;  %30 = vperm.xlu0 %2449, %v15_v9   ;;  %v2563_v47 = vsub.f32 %v95_v20, %v871_v37  ;;  %v140_v48 = vand.u32 4294901760, %v89_v33  ;;  %v2572_v51 = vpack.c.bf16 %v137_v40, %v134_v39  ;;  %v2574_v52 = vsub.f32 %v87_v25, %v134_v39  ;;  %v22_v62 = vld [vmem:[%s3234_s0 + $0x48] sm:$0x1]  ;;  %v17_v63 = vld [vmem:[%s3234_s0 + $0x20] sm:$0x1] }
   0xb   :  { %2276 = vmatprep.subr.bf16.mxu1 %v3241_v5  ;;  %v2576_v53 = vsub.f32 %v88_v26, %v137_v40  ;;  %v2582_v55 = vsub.f32 %v96_v27, %v874_v41  ;;  %v2584_v56 = vsub.f32 %v97_v32, %v877_v42  ;;  %v143_v57 = vand.u32 4294901760, %v90_v43 }
   0xc   :  { %2206 = vmatpush3.bf16.msra.mxu0 %v2544_v34  ;;  %v2586_v58 = vsub.f32 %v89_v33, %v140_v48  ;;  %v880_v60 = vand.u32 4294901760, %v98_v49  ;;  %v883_v61 = vand.u32 4294901760, %v99_v50  ;;  %v2599_v0 = vpack.c.bf16 %v877_v42, %v874_v41 }
   0xd   :  { %2207 = vmatprep.subr.bf16.mxu0 %v3241_v5  ;;  %2278 = vmatpush3.bf16.msra.mxu1 %v2559_v45  ;;  %v2601_v1 = vsub.f32 %v90_v43, %v143_v57  ;;  %v2603_v2 = vsel %vm117_vm0, %v91_v54, 0  ;;  %v2606_v3 = vpack.c.bf16 %v143_v57, %v140_v48  ;;  %v3237_v7 = vmov 0.0  }
   0xe   :  { %48 = vperm.xlu1 %2450, %v21_v38   ;;  %33 = vperm.xlu0 %2449, %v16_v44   ;;  %v2608_v4 = vsub.f32 %v98_v49, %v880_v60  ;;  %v2610_v6 = vsub.f32 %v99_v50, %v883_v61  ;;  %v2614_v8 = vsel %vm117_vm0, %v100_v59, 0  ;;  %v2617_v9 = vpack.c.bf16 %v883_v61, %v880_v60 }
   0xf   :  { %2279 = vmatprep.subr.bf16.mxu1 %v3241_v5  ;;  %1823 = vmatprep.mubr.msk.f32.mxu0 %vm2453_vm1, %v3237_v7  ;;  %v248_v10 = vand.u32 4294901760, %v2516_v22  ;;  %v255_v11 = vand.u32 4294901760, %v2518_v23  ;;  %v988_v12 = vand.u32 4294901760, %v2531_v29  ;;  %v2625_v13 = vand.u32 4294901760, %v2603_v2 }
  0x10   :  { %2209 = vmatpush3.bf16.msra.mxu0 %v2572_v51  ;;  %3252 = vst [vmem:[#allocation2_spill] sm:$0xff] %v2617_v9  ;;  %2021 = vmatprep.mubr.msk.f32.mxu1 %vm2453_vm1, %v3237_v7  ;;  %v995_v14 = vand.u32 4294901760, %v2533_v30  ;;  %v262_v15 = vand.u32 4294901760, %v2535_v31  ;;  %v3240_v16 = vand.u32 4294901760, %v2546_v35  ;;  %v2633_v17 = vand.u32 4294901760, %v2614_v8 }
  0x11   :  { %3253 = vst [vmem:[#allocation3_spill] sm:$0xff] %v2625_v13  ;;  %2210 = vmatprep.subr.bf16.mxu0 %v3241_v5  ;;  %2281 = vmatpush3.bf16.msra.mxu1 %v2599_v0  ;;  %v249_v18 = vsub.f32 %v2516_v22, %v248_v10  ;;  %v256_v19 = vsub.f32 %v2518_v23, %v255_v11  ;;  %v3239_v20 = vand.u32 4294901760, %v2561_v46  ;;  %v1009_v37 = vand.u32 4294901760, %v2563_v47 }
  0x12   :  { %51 = vperm.xlu1 %2450, %v22_v62   ;;  %36 = vperm.xlu0 %2449, %v17_v63   ;;  %v989_v24 = vsub.f32 %v2531_v29, %v988_v12  ;;  %v996_v25 = vsub.f32 %v2533_v30, %v995_v14  ;;  %v263_v26 = vsub.f32 %v2535_v31, %v262_v15  ;;  %v276_v48 = vand.u32 4294901760, %v2574_v52 }
  0x13   :  { %2282 = vmatprep.subr.bf16.mxu1 %v3241_v5  ;;  %v270_v27 = vsub.f32 %v2546_v35, %v3240_v16  ;;  %v250_v32 = vand.u32 4294901760, %v249_v18  ;;  %v257_v33 = vand.u32 4294901760, %v256_v19  ;;  %v1003_v36 = vsub.f32 %v2561_v46, %v3239_v20 }
  0x14   :  { %2212 = vmatpush3.bf16.msra.mxu0 %v2606_v3  ;;  %v990_v38 = vand.u32 4294901760, %v989_v24  ;;  %v997_v39 = vand.u32 4294901760, %v996_v25  ;;  %v264_v40 = vand.u32 4294901760, %v263_v26  ;;  %v1010_v44 = vsub.f32 %v2563_v47, %v1009_v37 }
  0x15   :  { %1821 = vmatprep.subr.mxu0 %v3237_v7  ;;  %v271_v41 = vand.u32 4294901760, %v270_v27  ;;  %2284 = vmatpush3.bf16.msra.mxu1 %v2617_v9  ;;  %v2662_v42 = vpack.c.bf16 %v257_v33, %v250_v32  ;;  %v1004_v43 = vand.u32 4294901760, %v1003_v36  ;;  %v283_v54 = vand.u32 4294901760, %v2576_v53 }
  0x16   :  { %2019 = vmatprep.subr.mxu1 %v3237_v7  ;;  %v2667_v49 = vpack.c.bf16 %v997_v39, %v990_v38  ;;  %v1016_v57 = vand.u32 4294901760, %v2582_v55  ;;  %v1011_v59 = vand.u32 4294901760, %v1010_v44  ;;  %v277_v60 = vsub.f32 %v2574_v52, %v276_v48 }
  0x17   :  { %v2669_v50 = vpack.c.bf16 %v271_v41, %v264_v40  ;;  %v1023_v61 = vand.u32 4294901760, %v2584_v56  ;;  %v290_v62 = vand.u32 4294901760, %v2586_v58  ;;  %v284_v63 = vsub.f32 %v2576_v53, %v283_v54 }
  0x18   :  { %1822 = vmatpush3.msra.mxu0 %v2625_v13  ;;  %v1017_v18 = vsub.f32 %v2582_v55, %v1016_v57  ;;  %v297_v19 = vand.u32 4294901760, %v2601_v1  ;;  %v1030_v24 = vand.u32 4294901760, %v2608_v4  ;;  %v2683_v25 = vpack.c.bf16 %v1011_v59, %v1004_v43 }
  0x19   :  { %2213 = vmatprep.subr.bf16.mxu0 %v3241_v5  ;;  %2020 = vmatpush3.msra.mxu1 %v2633_v17  ;;  %v278_v26 = vand.u32 4294901760, %v277_v60  ;;  %v1024_v27 = vsub.f32 %v2584_v56, %v1023_v61  ;;  %v291_v32 = vsub.f32 %v2586_v58, %v290_v62  ;;  %v285_v33 = vand.u32 4294901760, %v284_v63 }
  0x1a   :  { %2285 = vmatprep.subr.bf16.mxu1 %v3241_v5  ;;  %v1018_v36 = vand.u32 4294901760, %v1017_v18  ;;  %v298_v38 = vsub.f32 %v2601_v1, %v297_v19  ;;  %v1031_v39 = vsub.f32 %v2608_v4, %v1030_v24  ;;  %v1037_v44 = vand.u32 4294901760, %v2610_v6 }
  0x1b   :  { %v1025_v40 = vand.u32 4294901760, %v1024_v27  ;;  %v292_v41 = vand.u32 4294901760, %v291_v32  ;;  %v2691_v7 = vpack.c.bf16 %v285_v33, %v278_v26 }
  0x1c   :  { %v299_v43 = vand.u32 4294901760, %v298_v38  ;;  %v1032_v60 = vand.u32 4294901760, %v1031_v39  ;;  %v1038_v20 = vsub.f32 %v2610_v6, %v1037_v44  ;;  %v2720_v39 = vpack.c.bf16 %v255_v11, %v248_v10 }
  0x1d   :  { %v2693_v59 = vpack.c.bf16 %v1025_v40, %v1018_v36  ;;  %v2726_v40 = vpack.c.bf16 %v995_v14, %v988_v12  ;;  %v2738_v38 = vpack.c.bf16 %v283_v54, %v276_v48  ;;  %v2740_v10 = vpack.c.bf16 %v1023_v61, %v1016_v57 }
  0x1e   :  { %v2696_v16 = vpack.c.bf16 %v299_v43, %v292_v41  ;;  %v1039_v63 = vand.u32 4294901760, %v1038_v20  ;;  %3254 = vst [vmem:[#allocation4_spill] sm:$0xff] %v2720_v39  ;;  %v3256_v41 = vand.u32 4294901760, %v2546_v35  ;;  %v2742_v11 = vpack.c.bf16 %v297_v19, %v290_v62 }
  0x1f   :  { %3255 = vst [vmem:[#allocation5_spill] sm:$0xff] %v2726_v40  ;;  %3260 = vst [vmem:[#allocation8_spill] sm:$0xff] %v2738_v38  ;;  %v2744_v36 = vpack.c.bf16 %v1037_v44, %v1030_v24  ;;  %v11_v12 = vlaneseq }
  0x20   :  { %v2698_v18 = vpack.c.bf16 %v1039_v63, %v1032_v60  ;;  %v2732_v43 = vpack.c.bf16 %v3256_v41, %v262_v15  ;;  %v3258_v60 = vand.u32 4294901760, %v2561_v46  ;;  %3261 = vst [vmem:[#allocation9_spill] sm:$0xff] %v2740_v10  ;;  %3262 = vst [vmem:[#allocation10_spill] sm:$0xff] %v2742_v11  ;;  %v3264_v15 = vmov 0.0  }
  0x21   :  { %3263 = vst [vmem:[#allocation11_spill] sm:$0xff] %v2744_v36  ;;  %v2746_v14 = vand.u32 127, %v11_v12  ;;  %v2808_v11 = vsub.f32 %v2603_v2, %v2625_v13 }
  0x22   :  { %3257 = vst [vmem:[#allocation6_spill] sm:$0xff] %v2732_v43  ;;  %v2736_v63 = vpack.c.bf16 %v1009_v37, %v3258_v60 }
  0x24   :  { %3259 = vst [vmem:[#allocation7_spill] sm:$0xff] %v2736_v63 }
  0x81   :  { %v28_v20 = vpop.permute.xlu1 %27  ;;  %v25_v33 = vpop.permute.xlu0 %24 }
  0x82   :  { %vm54_vm3 = vcmp.eq.s32.totalorder %v28_v20, %v2746_v14  ;;  %vm53_vm4 = vcmp.eq.s32.totalorder %v25_v33, %v2746_v14 }
  0x83   :  { %v2751_v37 = vsel %vm54_vm3, 1.0, %v3264_v15  ;;  %v2754_v48 = vsel %vm53_vm4, 1.0, %v3264_v15 }
  0x84   :  { %v106_v54 = vsel %vm101_vm2, %v2751_v37, 0  ;;  %v103_v57 = vsel %vm101_vm2, %v2754_v48, 0 }
  0x85   :  { %v2760_v61 = vsub.f32 %v106_v54, %v106_v54  ;;  %v2762_v62 = vsub.f32 %v103_v57, %v103_v57  ;;  %v43_v19 = vpop.permute.xlu1 %42  ;;  %v40_v24 = vpop.permute.xlu0 %39 }
  0x86   :  { %vm59_vm5 = vcmp.eq.s32.totalorder %v43_v19, %v2746_v14  ;;  %vm58_vm6 = vcmp.eq.s32.totalorder %v40_v24, %v2746_v14 }
  0x87   :  { %v2767_v44 = vsel %vm59_vm5, 1.0, %v3264_v15  ;;  %v2770_v33 = vsel %vm58_vm6, 1.0, %v3264_v15  ;;  %v3243_v20 = vand.u32 4294901760, %v2762_v62  ;;  %v3244_v41 = vand.u32 4294901760, %v2760_v61 }
  0x88   :  { %v847_v60 = vsel %vm101_vm2, %v2767_v44, 0  ;;  %v844_v12 = vsel %vm101_vm2, %v2770_v33, 0 }
  0x89   :  { %v2778_v54 = vsub.f32 %v847_v60, %v847_v60  ;;  %v2780_v57 = vsub.f32 %v844_v12, %v844_v12  ;;  %v46_v19 = vpop.permute.xlu1 %45  ;;  %v31_v24 = vpop.permute.xlu0 %30  ;;  %v198_v32 = vsub.f32 %v2762_v62, %v3243_v20  ;;  %v208_v26 = vsub.f32 %v2760_v61, %v3244_v41 }
  0x8a   :  { %vm60_vm7 = vcmp.eq.s32.totalorder %v46_v19, %v2746_v14  ;;  %vm55_vm8 = vcmp.eq.s32.totalorder %v31_v24, %v2746_v14  ;;  %v3265_v24 = vmov 0.0|0.0  }
  0x8b   :  { %v2791_v27 = vsel %vm60_vm7, 1.0, %v3264_v15  ;;  %v2794_v60 = vsel %vm55_vm8, 1.0, %v3264_v15  ;;  %v199_v12 = vand.u32 4294901760, %v198_v32  ;;  %v3245_v19 = vand.u32 4294901760, %v2780_v57 }
  0x8c   :  { %v850_v5 = vsel %vm101_vm2, %v2791_v27, 0  ;;  %v109_v20 = vsel %vm101_vm2, %v2794_v60, 0 }
  0x8d   :  { %v2802_v36 = vsub.f32 %v850_v5, %v850_v5  ;;  %v2804_v41 = vsub.f32 %v109_v20, %v109_v20  ;;  %v49_v10 = vpop.permute.xlu1 %48  ;;  %1824 = vmatmul.mubr.f32.vlgmr.msra.gmra.mrb[0].mxu0 %v199_v12  ;;  %v34_v32 = vpop.permute.xlu0 %33  ;;  %v209_v5 = vand.u32 4294901760, %v208_v26  ;;  %v938_v20 = vsub.f32 %v2780_v57, %v3245_v19 }
  0x8e   :  { %vm61_vm9 = vcmp.eq.s32.totalorder %v49_v10, %v2746_v14  ;;  %vm56_vm10 = vcmp.eq.s32.totalorder %v34_v32, %v2746_v14  ;;  %1826 = vmatprep.mubr.msk.f32.mxu0 %vm2453_vm1, %v3264_v15  ;;  %2215 = vmatpush3.bf16.msra.mxu0 %v2662_v42  ;;  %v3266_v32 = vand.u32 4294901760, %v2778_v54  ;;  %v2840_v10 = vsub.f32 %v2614_v8, %v2633_v17 }
  0x8f   :  { %v2819_v2 = vsel %vm61_vm9, 1.0, %v3264_v15  ;;  %v2822_v12 = vsel %vm56_vm10, 1.0, %v3264_v15  ;;  %2216 = vmatprep.subr.bf16.mxu0 %v3265_v24  ;;  %v939_v19 = vand.u32 4294901760, %v938_v20  ;;  %v957_v63 = vand.u32 4294901760, %v2802_v36 }
  0x90   :  { %v948_v38 = vsub.f32 %v2778_v54, %v3266_v32  ;;  %v853_v42 = vsel %vm101_vm2, %v2819_v2, 0  ;;  %v112_v26 = vsel %vm101_vm2, %v2822_v12, 0  ;;  %v3267_v13 = vand.u32 4294901760, %v2804_v41 }
  0x91   :  { %v2834_v43 = vsub.f32 %v853_v42, %v853_v42  ;;  %v2836_v40 = vsub.f32 %v112_v26, %v112_v26  ;;  %v52_v39 = vpop.permute.xlu1 %51  ;;  %1827 = vmatmul.mubr.f32.gmra.mrb[2].mxu0 %v209_v5  ;;  %v37_v32 = vpop.permute.xlu0 %36  ;;  %2022 = vmatmul.mubr.f32.vlgmr.msra.gmra.mrb[0].mxu1 %v939_v19  ;;  %v3250_v42 = vand.u32 4294901760, %v2808_v11 }
  0x92   :  { %v218_v9 = vsub.f32 %v2804_v41, %v3267_v13  ;;  %vm62_vm11 = vcmp.eq.s32.totalorder %v52_v39, %v2746_v14  ;;  %vm57_vm12 = vcmp.eq.s32.totalorder %v37_v32, %v2746_v14  ;;  %1829 = vmatprep.mubr.msk.f32.mxu0 %vm2453_vm1, %v3264_v15  ;;  %v949_v20 = vand.u32 4294901760, %v948_v38  ;;  %2287 = vmatpush3.bf16.msra.mxu1 %v2667_v49 }
  0x93   :  { %v2851_v8 = vsel %vm62_vm11, 1.0, %v3264_v15  ;;  %v2855_v5 = vsel %vm57_vm12, 1.0, %v3264_v15  ;;  %2218 = vmatpush3.bf16.msra.mxu0 %v2669_v50  ;;  %v227_v39 = vand.u32 4294901760, %v2836_v40  ;;  %2024 = vmatprep.mubr.msk.f32.mxu1 %vm2453_vm1, %v3264_v15  ;;  %v958_v49 = vsub.f32 %v2802_v36, %v957_v63 }
  0x94   :  { %v219_v13 = vand.u32 4294901760, %v218_v9  ;;  %v856_v14 = vsel %vm101_vm2, %v2851_v8, 0  ;;  %v115_v38 = vsel %vm101_vm2, %v2855_v5, 0  ;;  %2288 = vmatprep.subr.bf16.mxu1 %v3265_v24  ;;  %v3251_v50 = vand.u32 4294901760, %v2834_v43  ;;  %2219 = vmatprep.subr.bf16.mxu0 %v3265_v24 }
  0x95   :  { %v2870_v9 = vsub.f32 %v856_v14, %v856_v14  ;;  %v2872_v19 = vsub.f32 %v115_v38, %v115_v38  ;;  %v228_v26 = vsub.f32 %v2836_v40, %v227_v39  ;;  %2025 = vmatmul.mubr.f32.gmra.mrb[2].mxu1 %v949_v20  ;;  %v1044_v38 = vand.u32 4294901760, %v2840_v10 }
  0x96   :  { %1830 = vmatmul.mubr.f32.gmra.mrb[4].mxu0 %v219_v13  ;;  %2290 = vmatpush3.bf16.msra.mxu1 %v2683_v25  ;;  %v305_v13 = vsub.f32 %v2808_v11, %v3250_v42  ;;  %v959_v20 = vand.u32 4294901760, %v958_v49  ;;  %v968_v25 = vsub.f32 %v2834_v43, %v3251_v50 }
  0x97   :  { %1832 = vmatprep.mubr.msk.f32.mxu0 %vm2453_vm1, %v3264_v15  ;;  %2221 = vmatpush3.bf16.msra.mxu0 %v2691_v7  ;;  %v229_v32 = vand.u32 4294901760, %v228_v26  ;;  %v237_v14 = vand.u32 4294901760, %v2872_v19  ;;  %v977_v7 = vand.u32 4294901760, %v2870_v9 }
  0x98   :  { %2027 = vmatprep.mubr.msk.f32.mxu1 %vm2453_vm1, %v3264_v15  ;;  %2291 = vmatprep.subr.bf16.mxu1 %v3265_v24  ;;  %v306_v42 = vand.u32 4294901760, %v305_v13  ;;  %v969_v50 = vand.u32 4294901760, %v968_v25 }
  0x99   :  { %2222 = vmatprep.subr.bf16.mxu0 %v3265_v24  ;;  %v238_v26 = vsub.f32 %v2872_v19, %v237_v14  ;;  %2028 = vmatmul.mubr.f32.gmra.mrb[4].mxu1 %v959_v20  ;;  %v978_v20 = vsub.f32 %v2870_v9, %v977_v7 }
  0x9a   :  { %1833 = vmatmul.mubr.f32.gmra.mrb[6].mxu0 %v229_v32  ;;  %2293 = vmatpush3.bf16.msra.mxu1 %v2693_v59  ;;  %v1045_v32 = vsub.f32 %v2840_v10, %v1044_v38 }
  0x9b   :  { %1835 = vmatprep.mubr.msk.f32.mxu0 %vm2453_vm1, %v3264_v15  ;;  %2224 = vmatpush3.bf16.msra.mxu0 %v2696_v16  ;;  %v239_v49 = vand.u32 4294901760, %v238_v26  ;;  %v979_v59 = vand.u32 4294901760, %v978_v20 }
  0x9c   :  { %2030 = vmatprep.mubr.msk.f32.mxu1 %vm2453_vm1, %v3264_v15  ;;  %2294 = vmatprep.subr.bf16.mxu1 %v3265_v24  ;;  %v1046_v16 = vand.u32 4294901760, %v1045_v32 }
  0x9d   :  { %1854 = vmatprep.subr.mxu0 %v3264_v15  ;;  %2031 = vmatmul.mubr.f32.gmra.mrb[6].mxu1 %v969_v50 }
  0x9e   :  { %1836 = vmatmul.mubr.f32.gmra.mrb[8].mxu0 %v239_v49  ;;  %2296 = vmatpush3.bf16.msra.mxu1 %v2698_v18  ;;  %v3268_v18 = vpack.c.bf16 %v2518_v23, %v2516_v22  ;;  %v3269_v22 = vpack.c.bf16 %v2533_v30, %v2531_v29  ;;  %v3270_v23 = vpack.c.bf16 %v2546_v35, %v2535_v31 }
  0x9f   :  { %1856 = vmatprep.mubr.msk.f32.mxu0 %vm2453_vm1, %v3264_v15  ;;  %1855 = vmatpush3.msra.mxu0 %v306_v42  ;;  %v3271_v29 = vpack.c.bf16 %v2563_v47, %v2561_v46  ;;  %v3272_v30 = vpack.c.bf16 %v2576_v53, %v2574_v52  ;;  %v3273_v31 = vpack.c.bf16 %v2584_v56, %v2582_v55  ;;  %v3276_v47 = vld [vmem:[#allocation2_spill] sm:$0xff]  ;;  %v3277_v52 = vld [vmem:[#allocation3_spill] sm:$0xff]  ;;  %v3278_v53 = vand.u32 4294901760, %v2762_v62  ;;  %v3279_v55 = vld [vmem:[#allocation4_spill] sm:$0xff] }
  0xa0   :  { %2033 = vmatprep.mubr.msk.f32.mxu1 %vm2453_vm1, %v3264_v15  ;;  %2052 = vmatprep.subr.mxu1 %v3264_v15  ;;  %v3274_v35 = vpack.c.bf16 %v2601_v1, %v2586_v58  ;;  %v3275_v46 = vpack.c.bf16 %v2610_v6, %v2608_v4  ;;  %v3280_v56 = vand.u32 4294901760, %v2760_v61  ;;  %v3281_v58 = vand.u32 4294901760, %v2780_v57  ;;  %v3282_v1 = vld [vmem:[#allocation5_spill] sm:$0xff]  ;;  %v3283_v4 = vld [vmem:[#allocation6_spill] sm:$0xff] }
  0xa1   :  { %2225 = vmatprep.subr.bf16.mxu0 %v3265_v24  ;;  %2034 = vmatmul.mubr.f32.gmra.mrb[8].mxu1 %v979_v59  ;;  %v3284_v6 = vand.u32 4294901760, %v2804_v41 }
  0xa2   :  { %1857 = vmatmul.mubr.msk.f32.vlgmr.msra.gmra.mrb[0].mxu0 %vm101_vm2, %v2754_v48  ;;  %2053 = vmatpush3.msra.mxu1 %v1046_v16 }
  0xa3   :  { %1859 = vmatprep.mubr.msk.f32.mxu0 %vm2453_vm1, %v3264_v15  ;;  %2227 = vmatpush3.bf16.msra.mxu0 %v3268_v18 }
  0xa4   :  { %2054 = vmatprep.mubr.msk.f32.mxu1 %vm2453_vm1, %v3264_v15  ;;  %2297 = vmatprep.subr.bf16.mxu1 %v3265_v24 }
  0xa5   :  { %2228 = vmatprep.subr.bf16.mxu0 %v3265_v24  ;;  %2055 = vmatmul.mubr.msk.f32.vlgmr.msra.gmra.mrb[0].mxu1 %vm101_vm2, %v2770_v33 }
  0xa6   :  { %1860 = vmatmul.mubr.msk.f32.gmra.mrb[2].mxu0 %vm101_vm2, %v2751_v37  ;;  %2299 = vmatpush3.bf16.msra.mxu1 %v3269_v22 }
  0xa7   :  { %1862 = vmatprep.mubr.msk.f32.mxu0 %vm2453_vm1, %v3264_v15  ;;  %2230 = vmatpush3.bf16.msra.mxu0 %v3270_v23 }
  0xa8   :  { %2057 = vmatprep.mubr.msk.f32.mxu1 %vm2453_vm1, %v3264_v15  ;;  %2300 = vmatprep.subr.bf16.mxu1 %v3265_v24 }
  0xa9   :  { %2231 = vmatprep.subr.bf16.mxu0 %v3265_v24  ;;  %2058 = vmatmul.mubr.msk.f32.gmra.mrb[2].mxu1 %vm101_vm2, %v2767_v44 }
  0xaa   :  { %1863 = vmatmul.mubr.msk.f32.gmra.mrb[4].mxu0 %vm101_vm2, %v2794_v60  ;;  %2302 = vmatpush3.bf16.msra.mxu1 %v3271_v29 }
  0xab   :  { %1865 = vmatprep.mubr.msk.f32.mxu0 %vm2453_vm1, %v3264_v15  ;;  %2233 = vmatpush3.bf16.msra.mxu0 %v3272_v30 }
  0xac   :  { %2060 = vmatprep.mubr.msk.f32.mxu1 %vm2453_vm1, %v3264_v15  ;;  %2303 = vmatprep.subr.bf16.mxu1 %v3265_v24 }
  0xad   :  { %2234 = vmatprep.subr.bf16.mxu0 %v3265_v24  ;;  %2061 = vmatmul.mubr.msk.f32.gmra.mrb[4].mxu1 %vm101_vm2, %v2791_v27 }
  0xae   :  { %1866 = vmatmul.mubr.msk.f32.gmra.mrb[6].mxu0 %vm101_vm2, %v2822_v12  ;;  %2305 = vmatpush3.bf16.msra.mxu1 %v3273_v31 }
  0xaf   :  { %1868 = vmatprep.mubr.msk.f32.mxu0 %vm2453_vm1, %v3264_v15  ;;  %2236 = vmatpush3.bf16.msra.mxu0 %v3274_v35 }
  0xb0   :  { %2063 = vmatprep.mubr.msk.f32.mxu1 %vm2453_vm1, %v3264_v15  ;;  %2306 = vmatprep.subr.bf16.mxu1 %v3265_v24 }
  0xb1   :  { %1887 = vmatprep.subr.mxu0 %v3264_v15  ;;  %2064 = vmatmul.mubr.msk.f32.gmra.mrb[6].mxu1 %vm101_vm2, %v2819_v2 }
  0xb2   :  { %1869 = vmatmul.mubr.msk.f32.gmra.mrb[8].mxu0 %vm101_vm2, %v2855_v5  ;;  %2308 = vmatpush3.bf16.msra.mxu1 %v3275_v46 }
  0xb3   :  { %1889 = vmatprep.mubr.msk.f32.mxu0 %vm2453_vm1, %v3264_v15  ;;  %1888 = vmatpush3.msra.mxu0 %v2808_v11 }
  0xb4   :  { %2066 = vmatprep.mubr.msk.f32.mxu1 %vm2453_vm1, %v3264_v15  ;;  %2085 = vmatprep.subr.mxu1 %v3264_v15 }
  0xb5   :  { %2237 = vmatprep.subr.bf16.mxu0 %v3265_v24  ;;  %2067 = vmatmul.mubr.msk.f32.gmra.mrb[8].mxu1 %vm101_vm2, %v2851_v8 }
  0xb6   :  { %1890 = vmatmul.mubr.f32.vlgmr.msra.gmra.mrb[0].mxu0 %v2762_v62  ;;  %2086 = vmatpush3.msra.mxu1 %v2840_v10  ;;  %v3286_v62 = vld [vmem:[#allocation7_spill] sm:$0xff] }
  0xb7   :  { %1892 = vmatprep.mubr.msk.f32.mxu0 %vm2453_vm1, %v3264_v15  ;;  %2239 = vmatpush3.bf16.msra.mxu0 %v2514_v21 }
  0xb8   :  { %2087 = vmatprep.mubr.msk.f32.mxu1 %vm2453_vm1, %v3264_v15  ;;  %2309 = vmatprep.subr.bf16.mxu1 %v3265_v24 }
  0xb9   :  { %2240 = vmatprep.subr.bf16.mxu0 %v3265_v24  ;;  %2088 = vmatmul.mubr.f32.vlgmr.msra.gmra.mrb[0].mxu1 %v2780_v57  ;;  %v3287_v57 = vld [vmem:[#allocation8_spill] sm:$0xff] }
  0xba   :  { %1893 = vmatmul.mubr.f32.gmra.mrb[2].mxu0 %v2760_v61  ;;  %2311 = vmatpush3.bf16.msra.mxu1 %v2529_v28  ;;  %v3285_v61 = vand.u32 4294901760, %v2778_v54 }
  0xbb   :  { %1895 = vmatprep.mubr.msk.f32.mxu0 %vm2453_vm1, %v3264_v15  ;;  %2242 = vmatpush3.bf16.msra.mxu0 %v2544_v34 }
  0xbc   :  { %2090 = vmatprep.mubr.msk.f32.mxu1 %vm2453_vm1, %v3264_v15  ;;  %2312 = vmatprep.subr.bf16.mxu1 %v3265_v24 }
  0xbd   :  { %2243 = vmatprep.subr.bf16.mxu0 %v3265_v24  ;;  %2091 = vmatmul.mubr.f32.gmra.mrb[2].mxu1 %v2778_v54  ;;  %v3289_v54 = vld [vmem:[#allocation10_spill] sm:$0xff] }
  0xbe   :  { %1896 = vmatmul.mubr.f32.gmra.mrb[4].mxu0 %v2804_v41  ;;  %2314 = vmatpush3.bf16.msra.mxu1 %v2559_v45  ;;  %v3288_v41 = vld [vmem:[#allocation9_spill] sm:$0xff] }
  0xbf   :  { %1898 = vmatprep.mubr.msk.f32.mxu0 %vm2453_vm1, %v3264_v15  ;;  %2245 = vmatpush3.bf16.msra.mxu0 %v2572_v51 }
  0xc0   :  { %2093 = vmatprep.mubr.msk.f32.mxu1 %vm2453_vm1, %v3264_v15  ;;  %2315 = vmatprep.subr.bf16.mxu1 %v3265_v24 }
  0xc1   :  { %2246 = vmatprep.subr.bf16.mxu0 %v3265_v24  ;;  %2094 = vmatmul.mubr.f32.gmra.mrb[4].mxu1 %v2802_v36  ;;  %v3290_v36 = vand.u32 4294901760, %v2834_v43 }
  0xc2   :  { %1899 = vmatmul.mubr.f32.gmra.mrb[6].mxu0 %v2836_v40  ;;  %2317 = vmatpush3.bf16.msra.mxu1 %v2599_v0  ;;  %v3291_v40 = vld [vmem:[#allocation11_spill] sm:$0xff] }
  0xc3   :  { %1901 = vmatprep.mubr.msk.f32.mxu0 %vm2453_vm1, %v3264_v15  ;;  %2248 = vmatpush3.bf16.msra.mxu0 %v2606_v3 }
  0xc4   :  { %2096 = vmatprep.mubr.msk.f32.mxu1 %vm2453_vm1, %v3264_v15  ;;  %2318 = vmatprep.subr.bf16.mxu1 %v3265_v24 }
  0xc5   :  { %1920 = vmatprep.subr.mxu0 %v3264_v15  ;;  %2097 = vmatmul.mubr.f32.gmra.mrb[6].mxu1 %v2834_v43 }
  0xc6   :  { %1902 = vmatmul.mubr.f32.gmra.mrb[8].mxu0 %v2872_v19  ;;  %2320 = vmatpush3.bf16.msra.mxu1 %v3276_v47 }
  0xc7   :  { %1922 = vmatprep.mubr.msk.f32.mxu0 %vm2453_vm1, %v3264_v15  ;;  %1921 = vmatpush3.msra.mxu0 %v3277_v52 }
  0xc8   :  { %2099 = vmatprep.mubr.msk.f32.mxu1 %vm2453_vm1, %v3264_v15  ;;  %2118 = vmatprep.subr.mxu1 %v3264_v15 }
  0xc9   :  { %2249 = vmatprep.subr.bf16.mxu0 %v3265_v24  ;;  %2100 = vmatmul.mubr.f32.gmra.mrb[8].mxu1 %v2870_v9 }
  0xca   :  { %1923 = vmatmul.mubr.f32.vlgmr.msra.gmra.mrb[0].mxu0 %v3278_v53  ;;  %2119 = vmatpush3.msra.mxu1 %v2633_v17 }
  0xcb   :  { %1925 = vmatprep.mubr.msk.f32.mxu0 %vm2453_vm1, %v3264_v15  ;;  %2251 = vmatpush3.bf16.msra.mxu0 %v3279_v55 }
  0xcc   :  { %2120 = vmatprep.mubr.msk.f32.mxu1 %vm2453_vm1, %v3264_v15  ;;  %2321 = vmatprep.subr.bf16.mxu1 %v3265_v24 }
  0xcd   :  { %2252 = vmatprep.subr.bf16.mxu0 %v3265_v24  ;;  %2121 = vmatmul.mubr.f32.vlgmr.msra.gmra.mrb[0].mxu1 %v3281_v58 }
  0xce   :  { %1926 = vmatmul.mubr.f32.gmra.mrb[2].mxu0 %v3280_v56  ;;  %2323 = vmatpush3.bf16.msra.mxu1 %v3282_v1 }
  0xcf   :  { %1928 = vmatprep.mubr.msk.f32.mxu0 %vm2453_vm1, %v3264_v15  ;;  %2254 = vmatpush3.bf16.msra.mxu0 %v3283_v4 }
  0xd0   :  { %2123 = vmatprep.mubr.msk.f32.mxu1 %vm2453_vm1, %v3264_v15  ;;  %2324 = vmatprep.subr.bf16.mxu1 %v3265_v24 }
  0xd1   :  { %2255 = vmatprep.subr.bf16.mxu0 %v3265_v24  ;;  %2124 = vmatmul.mubr.f32.gmra.mrb[2].mxu1 %v3285_v61 }
  0xd2   :  { %1929 = vmatmul.mubr.f32.gmra.mrb[4].mxu0 %v3284_v6  ;;  %2326 = vmatpush3.bf16.msra.mxu1 %v3286_v62 }
  0xd3   :  { %1931 = vmatprep.mubr.msk.f32.mxu0 %vm2453_vm1, %v3264_v15  ;;  %2257 = vmatpush3.bf16.msra.mxu0 %v3287_v57 }
  0xd4   :  { %2126 = vmatprep.mubr.msk.f32.mxu1 %vm2453_vm1, %v3264_v15  ;;  %2327 = vmatprep.subr.bf16.mxu1 %v3265_v24 }
  0xd5   :  { %2258 = vmatprep.subr.bf16.mxu0 %v3265_v24  ;;  %2127 = vmatmul.mubr.f32.gmra.mrb[4].mxu1 %v957_v63  ;;  %v3292_v63 = vand.u32 4294901760, %v2808_v11 }
  0xd6   :  { %1932 = vmatmul.mubr.f32.gmra.mrb[6].mxu0 %v227_v39  ;;  %2329 = vmatpush3.bf16.msra.mxu1 %v3288_v41 }
  0xd7   :  { %1934 = vmatprep.mubr.msk.f32.mxu0 %vm2453_vm1, %v3264_v15  ;;  %2260 = vmatpush3.bf16.msra.mxu0 %v3289_v54 }
  0xd8   :  { %2129 = vmatprep.mubr.msk.f32.mxu1 %vm2453_vm1, %v3264_v15  ;;  %2330 = vmatprep.subr.bf16.mxu1 %v3265_v24 }
  0xd9   :  { %1953 = vmatprep.subr.mxu0 %v3264_v15  ;;  %2130 = vmatmul.mubr.f32.gmra.mrb[6].mxu1 %v3290_v36 }
  0xda   :  { %1935 = vmatmul.mubr.f32.gmra.mrb[8].mxu0 %v237_v14  ;;  %2332 = vmatpush3.bf16.msra.mxu1 %v3291_v40 }
  0xdb   :  { %1955 = vmatprep.mubr.msk.f32.mxu0 %vm2453_vm1, %v3264_v15  ;;  %1954 = vmatpush3.msra.mxu0 %v3292_v63 }
  0xdc   :  { %2132 = vmatprep.mubr.msk.f32.mxu1 %vm2453_vm1, %v3264_v15  ;;  %2151 = vmatprep.subr.mxu1 %v3264_v15 }
  0xdd   :  { %2261 = vmatprep.subr.bf16.mxu0 %v3265_v24  ;;  %2133 = vmatmul.mubr.f32.gmra.mrb[8].mxu1 %v977_v7 }
  0xde   :  { %1956 = vmatmul.mubr.msk.f32.vlgmr.msra.gmra.mrb[0].mxu0 %vm101_vm2, %v2754_v48  ;;  %2152 = vmatpush3.msra.mxu1 %v1044_v38 }
  0xdf   :  { %1958 = vmatprep.mubr.msk.f32.mxu0 %vm2453_vm1, %v3264_v15  ;;  %2263 = vmatpush3.bf16.msra.mxu0 %v2514_v21 }
  0xe0   :  { %2153 = vmatprep.mubr.msk.f32.mxu1 %vm2453_vm1, %v3264_v15  ;;  %2333 = vmatprep.subr.bf16.mxu1 %v3265_v24 }
  0xe1   :  { %2264 = vmatprep.subr.bf16.mxu0 %v3265_v24  ;;  %2154 = vmatmul.mubr.msk.f32.vlgmr.msra.gmra.mrb[0].mxu1 %vm101_vm2, %v2770_v33 }
  0xe2   :  { %1959 = vmatmul.mubr.msk.f32.gmra.mrb[2].mxu0 %vm101_vm2, %v2751_v37  ;;  %2335 = vmatpush3.bf16.msra.mxu1 %v2529_v28 }
  0xe3   :  { %1961 = vmatprep.mubr.msk.f32.mxu0 %vm2453_vm1, %v3264_v15  ;;  %2266 = vmatpush3.bf16.msra.mxu0 %v2544_v34 }
  0xe4   :  { %2156 = vmatprep.mubr.msk.f32.mxu1 %vm2453_vm1, %v3264_v15  ;;  %2336 = vmatprep.subr.bf16.mxu1 %v3265_v24 }
  0xe5   :  { %2267 = vmatprep.subr.bf16.mxu0 %v3265_v24  ;;  %2157 = vmatmul.mubr.msk.f32.gmra.mrb[2].mxu1 %vm101_vm2, %v2767_v44 }
  0xe6   :  { %1962 = vmatmul.mubr.msk.f32.gmra.mrb[4].mxu0 %vm101_vm2, %v2794_v60  ;;  %2338 = vmatpush3.bf16.msra.mxu1 %v2559_v45 }
  0xe7   :  { %1964 = vmatprep.mubr.msk.f32.mxu0 %vm2453_vm1, %v3264_v15  ;;  %2269 = vmatpush3.bf16.msra.mxu0 %v2572_v51 }
  0xe8   :  { %2159 = vmatprep.mubr.msk.f32.mxu1 %vm2453_vm1, %v3264_v15  ;;  %2339 = vmatprep.subr.bf16.mxu1 %v3265_v24 }
  0xe9   :  { %2270 = vmatprep.subr.bf16.mxu0 %v3265_v24  ;;  %2160 = vmatmul.mubr.msk.f32.gmra.mrb[4].mxu1 %vm101_vm2, %v2791_v27 }
  0xea   :  { %1965 = vmatmul.mubr.msk.f32.gmra.mrb[6].mxu0 %vm101_vm2, %v2822_v12  ;;  %2341 = vmatpush3.bf16.msra.mxu1 %v2599_v0 }
  0xeb   :  { %1967 = vmatprep.mubr.msk.f32.mxu0 %vm2453_vm1, %v3264_v15  ;;  %2272 = vmatpush3.bf16.msra.mxu0 %v2606_v3 }
  0xec   :  { %2162 = vmatprep.mubr.msk.f32.mxu1 %vm2453_vm1, %v3264_v15  ;;  %2342 = vmatprep.subr.bf16.mxu1 %v3265_v24 }
  0xed   :  { %1986 = vmatprep.subr.mxu0 %v3264_v15  ;;  %2163 = vmatmul.mubr.msk.f32.gmra.mrb[6].mxu1 %vm101_vm2, %v2819_v2 }
  0xee   :  { %1968 = vmatmul.mubr.msk.f32.gmra.mrb[8].mxu0 %vm101_vm2, %v2855_v5  ;;  %2344 = vmatpush3.bf16.msra.mxu1 %v3276_v47 }
  0xef   :  { %1988 = vmatprep.mubr.msk.f32.mxu0 %vm2453_vm1, %v3264_v15  ;;  %1987 = vmatpush3.msra.mxu0 %v3277_v52 }
  0xf0   :  { %2165 = vmatprep.mubr.msk.f32.mxu1 %vm2453_vm1, %v3264_v15  ;;  %2184 = vmatprep.subr.mxu1 %v3264_v15 }
  0xf1   :  { %2166 = vmatmul.mubr.msk.f32.gmra.mrb[8].mxu1 %vm101_vm2, %v2851_v8 }
  0xf2   :  { %1989 = vmatmul.mubr.msk.f32.vlgmr.msra.gmra.mrb[0].mxu0 %vm101_vm2, %v2754_v48  ;;  %2185 = vmatpush3.msra.mxu1 %v2633_v17 }
  0xf3   :  { %1991 = vmatprep.mubr.msk.f32.mxu0 %vm2453_vm1, %v3264_v15  ;;  %2186 = vmatprep.mubr.msk.f32.mxu1 %vm2453_vm1, %v3264_v15 }
  0xf5   :  { %2187 = vmatmul.mubr.msk.f32.vlgmr.msra.gmra.mrb[0].mxu1 %vm101_vm2, %v2770_v33 }
  0xf6   :  { %1992 = vmatmul.mubr.msk.f32.gmra.mrb[2].mxu0 %vm101_vm2, %v2751_v37  ;;  %2189 = vmatprep.mubr.msk.f32.mxu1 %vm2453_vm1, %v3264_v15 }
  0xf7   :  { %1994 = vmatprep.mubr.msk.f32.mxu0 %vm2453_vm1, %v3264_v15 }
  0xf9   :  { %2190 = vmatmul.mubr.msk.f32.gmra.mrb[2].mxu1 %vm101_vm2, %v2767_v44 }
  0xfa   :  { %1995 = vmatmul.mubr.msk.f32.gmra.mrb[4].mxu0 %vm101_vm2, %v2794_v60  ;;  %2192 = vmatprep.mubr.msk.f32.mxu1 %vm2453_vm1, %v3264_v15 }
  0xfb   :  { %1997 = vmatprep.mubr.msk.f32.mxu0 %vm2453_vm1, %v3264_v15 }
  0xfd   :  { %2193 = vmatmul.mubr.msk.f32.gmra.mrb[4].mxu1 %vm101_vm2, %v2791_v27 }
  0xfe   :  { %1998 = vmatmul.mubr.msk.f32.gmra.mrb[6].mxu0 %vm101_vm2, %v2822_v12  ;;  %2195 = vmatprep.mubr.msk.f32.mxu1 %vm2453_vm1, %v3264_v15 }
  0xff   :  { %2000 = vmatprep.mubr.msk.f32.mxu0 %vm2453_vm1, %v3264_v15 }
 0x101   :  { %2196 = vmatmul.mubr.msk.f32.gmra.mrb[6].mxu1 %vm101_vm2, %v2819_v2 }
 0x102   :  { %2001 = vmatmul.mubr.msk.f32.gmra.mrb[8].mxu0 %vm101_vm2, %v2855_v5  ;;  %2198 = vmatprep.mubr.msk.f32.mxu1 %vm2453_vm1, %v3264_v15 }
 0x105   :  { %2199 = vmatmul.mubr.msk.f32.gmra.mrb[8].mxu1 %vm101_vm2, %v2851_v8 }
 0x1c5   :  { %v815_v21 = vpop.f32.mrb[0].mxu0 }
 0x1c6   :  { %1583 = vst [vmem:[%s3236_s2] sm:$0xff] %v815_v21  ;;  %v1990_v28 = vpop.f32.mrb[1].mxu0 }
 0x1c8   :  { %v1555_v45 = vpop.f32.mrb[0].mxu1 }
 0x1c9   :  { %v821_v34 = vpop.f32.mrb[2].mxu0  ;;  %1588 = vst [vmem:[%s3236_s2 + $0x28] sm:$0xff] %v1555_v45  ;;  %v2188_v0 = vpop.f32.mrb[1].mxu1 }
 0x1ca   :  { %1584 = vst [vmem:[%s3236_s2 + $0x8] sm:$0xff] %v821_v34  ;;  %v1993_v51 = vpop.f32.mrb[3].mxu0 }
 0x1cc   :  { %v1561_v17 = vpop.f32.mrb[2].mxu1 }
 0x1cd   :  { %v827_v3 = vpop.f32.mrb[4].mxu0  ;;  %1589 = vst [vmem:[%s3236_s2 + $0x30] sm:$0xff] %v1561_v17  ;;  %v2191_v43 = vpop.f32.mrb[3].mxu1 }
 0x1ce   :  { %1585 = vst [vmem:[%s3236_s2 + $0x10] sm:$0xff] %v827_v3  ;;  %v1996_v27 = vpop.f32.mrb[5].mxu0 }
 0x1d0   :  { %v1567_v15 = vpop.f32.mrb[4].mxu1 }
 0x1d1   :  { %v833_v11 = vpop.f32.mrb[6].mxu0  ;;  %1590 = vst [vmem:[%s3236_s2 + $0x38] sm:$0xff] %v1567_v15  ;;  %v2194_v48 = vpop.f32.mrb[5].mxu1 }
 0x1d2   :  { %1586 = vst [vmem:[%s3236_s2 + $0x18] sm:$0xff] %v833_v11  ;;  %v1999_v37 = vpop.f32.mrb[7].mxu0 }
 0x1d4   :  { %v1573_v33 = vpop.f32.mrb[6].mxu1 }
 0x1d5   :  { %v839_v44 = vpop.f32.mrb[8].mxu0  ;;  %1591 = vst [vmem:[%s3236_s2 + $0x40] sm:$0xff] %v1573_v33  ;;  %v2197_v24 = vpop.f32.mrb[7].mxu1 }
 0x1d6   :  { %1587 = vst [vmem:[%s3236_s2 + $0x20] sm:$0x1] %v839_v44  ;;  %v2002_v60 = vpop.f32.mrb[9].mxu0 }
 0x1d8   :  { %v1579_v2 = vpop.f32.mrb[8].mxu1 }
 0x1d9   :  { %1592 = vst [vmem:[%s3236_s2 + $0x48] sm:$0x1] %v1579_v2  ;;  %v2200_v12 = vpop.f32.mrb[9].mxu1 }

</bundles_post_ra>
